<compile_context>
chip_gen: v7x
topology: tpu7x:2x2x1
jax: 0.10.0
libtpu: 0.0.40
codegen_flags: <defaults>
</compile_context>

<pallas_src>
import jax
import jax.numpy as jnp
import numpy as np
from jax.experimental import pallas as pl
from jax.experimental.pallas import tpu as pltpu

# Small problem sizes consistent with the module's forward.
B, S = 2, 8            # batch, source sequence length
E, H = 16, 32          # emb_dim, hid_dim
L = 2                  # n_layers
V = 64                 # output_dim (vocab)


def decoder_kernel(tok_ref, emb_tbl_ref, hid_ref, cell_ref, enc_ref, encp_ref,
                   wah_ref, ba_ref, va_ref,
                   wie_ref, wiw_ref, wihd_ref, whh_ref, b_ref,
                   wfch_ref, wfcw_ref, bfc_ref,
                   pred_ref, hid_out_ref, cell_out_ref, attn_ref):
    # ---- fused embedding lookup: one_hot(token) @ table on the MXU ----
    tok = tok_ref[...]                                                   # [B, 1] int32
    col = jax.lax.broadcasted_iota(jnp.int32, (B, V), 1)                 # [B, V]
    onehot = (col == tok).astype(jnp.float32)                            # [B, V]
    emb = jnp.dot(onehot, emb_tbl_ref[...],
                  preferred_element_type=jnp.float32)                    # [B, E]
    # dropout: eval-mode identity (see TODO at top)

    h_top = hid_ref[L - 1]                                               # [B, H]  (hidden[-1])

    # ---- attention: energy = tanh(enc_proj + h@Wa_h + b), score = energy . v ----
    # enc_proj (= enc @ Wa_e) is precomputed outside the kernel (step-invariant).
    hid_proj = jnp.dot(h_top, wah_ref[...], preferred_element_type=jnp.float32)      # [B, H]
    energy = jnp.tanh(encp_ref[...] + hid_proj[:, None, :] + ba_ref[...][None, :, :])  # [B,S,H]
    scores = jnp.sum(energy * va_ref[...][None, :, :], axis=-1)          # [B, S]
    scores = scores - jnp.max(scores, axis=-1, keepdims=True)
    expd = jnp.exp(scores)
    attn = expd / jnp.sum(expd, axis=-1, keepdims=True)                  # [B, S]
    attn_ref[...] = attn

    # weighted context: bmm(attn[B,1,S], enc[B,S,H]).squeeze(1)
    weighted = jnp.sum(attn[:, :, None] * enc_ref[...], axis=1)          # [B, H]

    # ---- LSTM, single time step, L stacked layers (split-weight matmuls) ----
    h_new_layers = []
    c_new_layers = []
    x = None
    for l in range(L):
        if l == 0:
            gates_in = (jnp.dot(emb, wie_ref[...], preferred_element_type=jnp.float32)
                        + jnp.dot(weighted, wiw_ref[...], preferred_element_type=jnp.float32))
        else:
            gates_in = jnp.dot(x, wihd_ref[l - 1], preferred_element_type=jnp.float32)
        gates = (gates_in
                 + jnp.dot(hid_ref[l], whh_ref[l], preferred_element_type=jnp.float32)
                 + b_ref[l])                                             # [B, 4H]
        i_g = jax.nn.sigmoid(gates[:, 0:H])
        f_g = jax.nn.sigmoid(gates[:, H:2 * H])
        g_g = jnp.tanh(gates[:, 2 * H:3 * H])
        o_g = jax.nn.sigmoid(gates[:, 3 * H:4 * H])
        c_new = f_g * cell_ref[l] + i_g * g_g
        h_new = o_g * jnp.tanh(c_new)
        h_new_layers.append(h_new)
        c_new_layers.append(c_new)
        x = h_new                                                        # [B, H]

    # single full-ref stores (output buffers are aliased with the input state)
    hid_out_ref[...] = jnp.stack(h_new_layers, axis=0)                   # [L, B, H]
    cell_out_ref[...] = jnp.stack(c_new_layers, axis=0)                  # [L, B, H]

    # ---- prediction = fc_out([output ; weighted]) via split weights ----
    pred_ref[...] = (jnp.dot(x, wfch_ref[...], preferred_element_type=jnp.float32)
                     + jnp.dot(weighted, wfcw_ref[...], preferred_element_type=jnp.float32)
                     + bfc_ref[...])


def _decoder_step(tok, hidden, cell, enc_out, enc_proj, p):
    vmem = pl.BlockSpec(memory_space=pltpu.MemorySpace.VMEM)
    bias = p["b_ih"] + p["b_hh"]            # fold the two LSTM biases (step-invariant)
    ins = (tok, p["embedding"], hidden, cell, enc_out, enc_proj,
           p["wa_h"], p["b_a"], p["v_a"],
           p["w_ie"], p["w_iw"], p["w_ih_deep"], p["w_hh"], bias,
           p["w_fc_h"], p["w_fc_w"], p["b_fc"])
    out_shapes = (
        jax.ShapeDtypeStruct((B, V), jnp.float32),      # prediction
        jax.ShapeDtypeStruct((L, B, H), jnp.float32),   # hidden
        jax.ShapeDtypeStruct((L, B, H), jnp.float32),   # cell
        jax.ShapeDtypeStruct((B, S), jnp.float32),      # attn weights
    )
    return pl.pallas_call(
        decoder_kernel,
        out_shape=out_shapes,
        in_specs=[vmem] * len(ins),
        out_specs=(vmem,) * 4,
        # P8: update LSTM state in place across decode steps
        # (input 2 = hidden -> output 1, input 3 = cell -> output 2)
        input_output_aliases={2: 1, 3: 2},
    )(*ins)


@jax.jit
def decoder_forward(token_ids, hidden, cell, enc_out, p):
    # Step-invariant precompute: in a real decode loop this is done ONCE per
    # sequence (encoder_outputs are constant across steps), not per step.
    enc_proj = jnp.einsum("bsh,hk->bsk", enc_out, p["wa_e"])
    tok = token_ids.astype(jnp.int32).reshape(B, 1)
    return _decoder_step(tok, hidden, cell, enc_out, enc_proj, p)


def reference(token_ids, hidden, cell, enc, p):
    emb = p["embedding"][token_ids]
    h_top = hidden[-1]
    hid_proj = h_top @ p["wa_h"]
    enc_proj = jnp.einsum("bsh,hk->bsk", enc, p["wa_e"])
    energy = jnp.tanh(enc_proj + hid_proj[:, None, :] + p["b_a"][None])
    scores = jnp.sum(energy * p["v_a"][None], axis=-1)
    attn = jax.nn.softmax(scores, axis=-1)
    weighted = jnp.einsum("bs,bsh->bh", attn, enc)
    h_out, c_out = [], []
    x = None
    for l in range(L):
        if l == 0:
            g_in = emb @ p["w_ie"] + weighted @ p["w_iw"]
        else:
            g_in = x @ p["w_ih_deep"][l - 1]
        gates = g_in + hidden[l] @ p["w_hh"][l] + p["b_ih"][l] + p["b_hh"][l]
        i_g = jax.nn.sigmoid(gates[:, 0:H])
        f_g = jax.nn.sigmoid(gates[:, H:2 * H])
        g_g = jnp.tanh(gates[:, 2 * H:3 * H])
        o_g = jax.nn.sigmoid(gates[:, 3 * H:4 * H])
        c_new = f_g * cell[l] + i_g * g_g
        h_new = o_g * jnp.tanh(c_new)
        h_out.append(h_new)
        c_out.append(c_new)
        x = h_new
    pred = x @ p["w_fc_h"] + weighted @ p["w_fc_w"] + p["b_fc"]
    return pred, jnp.stack(h_out), jnp.stack(c_out), attn


def init_params(key):
    ks = jax.random.split(key, 14)
    s = 0.1
    p = {
        "embedding": s * jax.random.normal(ks[0], (V, E), jnp.float32),
        # attention Linear(2H -> H) split into hidden / encoder halves (pre-transposed)
        "wa_h": s * jax.random.normal(ks[1], (H, H), jnp.float32),
        "wa_e": s * jax.random.normal(ks[2], (H, H), jnp.float32),
        "b_a":  s * jax.random.normal(ks[3], (1, H), jnp.float32),
        "v_a":  s * jax.random.normal(ks[4], (1, H), jnp.float32),
        # LSTM layer-0 input weight split into embedding / weighted-context halves
        "w_ie": s * jax.random.normal(ks[5], (E, 4 * H), jnp.float32),
        "w_iw": s * jax.random.normal(ks[6], (H, 4 * H), jnp.float32),
        # layers >= 1 input weights (input is previous layer's h, size H) -- no zero-padding
        "w_ih_deep": s * jax.random.normal(ks[7], (L - 1, H, 4 * H), jnp.float32),
        "w_hh": s * jax.random.normal(ks[8], (L, H, 4 * H), jnp.float32),
        "b_ih": s * jax.random.normal(ks[9], (L, 1, 4 * H), jnp.float32),
        "b_hh": s * jax.random.normal(ks[10], (L, 1, 4 * H), jnp.float32),
        # fc_out Linear(2H -> V) split into output / weighted halves (pre-transposed)
        "w_fc_h": s * jax.random.normal(ks[11], (H, V), jnp.float32),
        "w_fc_w": s * jax.random.normal(ks[12], (H, V), jnp.float32),
        "b_fc":   s * jax.random.normal(ks[13], (1, V), jnp.float32),
    }
    return p


if __name__ == "__main__":
    key = jax.random.PRNGKey(0)
    kp, k1, k2, k3, k4 = jax.random.split(key, 5)
    params = init_params(kp)

    token_ids = jax.random.randint(k1, (B,), 0, V)                         # [B]
    hidden = 0.1 * jax.random.normal(k2, (L, B, H), jnp.float32)           # [L, B, H]
    cell = 0.1 * jax.random.normal(k3, (L, B, H), jnp.float32)             # [L, B, H]
    enc_out = 0.1 * jax.random.normal(k4, (B, S, H), jnp.float32)          # [B, S, H]

    # reference first (inputs are not donated, but keep ordering conservative)
    r_pred, r_h, r_c, r_attn = reference(token_ids, hidden, cell, enc_out, params)
    jax.block_until_ready((r_pred, r_h, r_c, r_attn))

    pred, h_new, c_new, attn = decoder_forward(token_ids, hidden, cell, enc_out, params)
    jax.block_until_ready((pred, h_new, c_new, attn))

    np.testing.assert_allclose(np.asarray(pred), np.asarray(r_pred), atol=1e-4, rtol=1e-4)
    np.testing.assert_allclose(np.asarray(h_new), np.asarray(r_h), atol=1e-4, rtol=1e-4)
    np.testing.assert_allclose(np.asarray(c_new), np.asarray(r_c), atol=1e-4, rtol=1e-4)
    np.testing.assert_allclose(np.asarray(attn), np.asarray(r_attn), atol=1e-4, rtol=1e-4)

    print("KERNEL_OK")
</pallas_src>

<mosaic_0001>
module attributes {stable_mosaic.version = 11 : i64} {
  func.func @decoder_kernel(%arg0: memref<2x1xi32, #tpu.memory_space<vmem>>, %arg1: memref<64x16xf32, #tpu.memory_space<vmem>>, %arg2: memref<2x2x32xf32, #tpu.memory_space<vmem>>, %arg3: memref<2x2x32xf32, #tpu.memory_space<vmem>>, %arg4: memref<2x8x32xf32, #tpu.memory_space<vmem>>, %arg5: memref<2x8x32xf32, #tpu.memory_space<vmem>>, %arg6: memref<32x32xf32, #tpu.memory_space<vmem>>, %arg7: memref<1x32xf32, #tpu.memory_space<vmem>>, %arg8: memref<1x32xf32, #tpu.memory_space<vmem>>, %arg9: memref<16x128xf32, #tpu.memory_space<vmem>>, %arg10: memref<32x128xf32, #tpu.memory_space<vmem>>, %arg11: memref<1x32x128xf32, #tpu.memory_space<vmem>>, %arg12: memref<2x32x128xf32, #tpu.memory_space<vmem>>, %arg13: memref<2x1x128xf32, #tpu.memory_space<vmem>>, %arg14: memref<32x64xf32, #tpu.memory_space<vmem>>, %arg15: memref<32x64xf32, #tpu.memory_space<vmem>>, %arg16: memref<1x64xf32, #tpu.memory_space<vmem>>, %arg17: memref<2x64xf32, #tpu.memory_space<vmem>>, %arg18: memref<2x2x32xf32, #tpu.memory_space<vmem>>, %arg19: memref<2x2x32xf32, #tpu.memory_space<vmem>>, %arg20: memref<2x8xf32, #tpu.memory_space<vmem>>) attributes {dimension_semantics = [], scalar_prefetch = 0 : i64, scratch_operands = 0 : i64, tpu.core_type = #tpu.core_type<tc>} {
    %c0 = arith.constant 0 : index
    %c0_0 = arith.constant 0 : index
    %0 = vector.load %arg0[%c0, %c0_0] : memref<2x1xi32, #tpu.memory_space<vmem>>, vector<2x1xi32>
    %1 = tpu.iota {dimensions = array<i32: 1>} : vector<2x64xi32>
    %2 = vector.broadcast %0 : vector<2x1xi32> to vector<2x64xi32>
    %3 = arith.cmpi eq, %1, %2 : vector<2x64xi32>
    %4 = arith.extui %3 : vector<2x64xi1> to vector<2x64xi32>
    %5 = arith.sitofp %4 : vector<2x64xi32> to vector<2x64xf32>
    %c0_1 = arith.constant 0 : index
    %c0_2 = arith.constant 0 : index
    %6 = vector.load %arg1[%c0_1, %c0_2] : memref<64x16xf32, #tpu.memory_space<vmem>>, vector<64x16xf32>
    %cst = arith.constant dense<0.000000e+00> : vector<2x16xf32>
    %7 = tpu.matmul %5, %6, %cst {dimension_numbers = #tpu.dot_dimension_numbers<[1], [0], [0], [1], [0, 0, 1, 1], [], []>} : vector<2x64xf32>, vector<64x16xf32>, vector<2x16xf32> -> vector<2x16xf32>
    %c1 = arith.constant 1 : index
    %c0_3 = arith.constant 0 : index
    %c0_4 = arith.constant 0 : index
    %8 = vector.load %arg2[%c1, %c0_3, %c0_4] : memref<2x2x32xf32, #tpu.memory_space<vmem>>, vector<1x2x32xf32>
    %9 = vector.shape_cast %8 : vector<1x2x32xf32> to vector<2x32xf32>
    %c0_5 = arith.constant 0 : index
    %c0_6 = arith.constant 0 : index
    %10 = vector.load %arg6[%c0_5, %c0_6] : memref<32x32xf32, #tpu.memory_space<vmem>>, vector<32x32xf32>
    %cst_7 = arith.constant dense<0.000000e+00> : vector<2x32xf32>
    %11 = tpu.matmul %9, %10, %cst_7 {dimension_numbers = #tpu.dot_dimension_numbers<[1], [0], [0], [1], [0, 0, 1, 1], [], []>} : vector<2x32xf32>, vector<32x32xf32>, vector<2x32xf32> -> vector<2x32xf32>
    %c0_8 = arith.constant 0 : index
    %c0_9 = arith.constant 0 : index
    %c0_10 = arith.constant 0 : index
    %12 = vector.load %arg5[%c0_8, %c0_9, %c0_10] : memref<2x8x32xf32, #tpu.memory_space<vmem>>, vector<2x8x32xf32>
    %13 = vector.shape_cast %11 : vector<2x32xf32> to vector<2x1x32xf32>
    %14 = vector.broadcast %13 : vector<2x1x32xf32> to vector<2x8x32xf32>
    %15 = arith.addf %12, %14 : vector<2x8x32xf32>
    %c0_11 = arith.constant 0 : index
    %c0_12 = arith.constant 0 : index
    %16 = vector.load %arg7[%c0_11, %c0_12] : memref<1x32xf32, #tpu.memory_space<vmem>>, vector<1x32xf32>
    %17 = vector.shape_cast %16 : vector<1x32xf32> to vector<1x1x32xf32>
    %18 = vector.broadcast %17 : vector<1x1x32xf32> to vector<2x8x32xf32>
    %19 = arith.addf %15, %18 : vector<2x8x32xf32>
    %20 = math.tanh %19 : vector<2x8x32xf32>
    %c0_13 = arith.constant 0 : index
    %c0_14 = arith.constant 0 : index
    %21 = vector.load %arg8[%c0_13, %c0_14] : memref<1x32xf32, #tpu.memory_space<vmem>>, vector<1x32xf32>
    %22 = vector.shape_cast %21 : vector<1x32xf32> to vector<1x1x32xf32>
    %23 = vector.broadcast %22 : vector<1x1x32xf32> to vector<2x8x32xf32>
    %24 = arith.mulf %20, %23 : vector<2x8x32xf32>
    %cst_15 = arith.constant dense<0.000000e+00> : vector<2x8xf32>
    %25 = vector.multi_reduction <add>, %24, %cst_15 [2] : vector<2x8x32xf32> to vector<2x8xf32>
    %cst_16 = arith.constant dense<0xFF800000> : vector<2xf32>
    %26 = vector.multi_reduction <maximumf>, %25, %cst_16 [1] : vector<2x8xf32> to vector<2xf32>
    %27 = vector.shape_cast %26 : vector<2xf32> to vector<2x1xf32>
    %28 = vector.broadcast %27 : vector<2x1xf32> to vector<2x8xf32>
    %29 = arith.subf %25, %28 : vector<2x8xf32>
    %30 = math.exp %29 : vector<2x8xf32>
    %cst_17 = arith.constant dense<0.000000e+00> : vector<2xf32>
    %31 = vector.multi_reduction <add>, %30, %cst_17 [1] : vector<2x8xf32> to vector<2xf32>
    %32 = vector.shape_cast %31 : vector<2xf32> to vector<2x1xf32>
    %33 = vector.broadcast %32 : vector<2x1xf32> to vector<2x8xf32>
    %34 = arith.divf %30, %33 : vector<2x8xf32>
    %c0_18 = arith.constant 0 : index
    %c0_19 = arith.constant 0 : index
    %35 = vector.load %arg20[%c0_18, %c0_19] : memref<2x8xf32, #tpu.memory_space<vmem>>, vector<2x8xf32>
    tpu.vector_store %arg20[%c0_18, %c0_19], %34 {strides = array<i32>} : memref<2x8xf32, #tpu.memory_space<vmem>>, vector<2x8xf32>,
    %36 = vector.shape_cast %34 : vector<2x8xf32> to vector<2x8x1xf32>
    %c0_20 = arith.constant 0 : index
    %c0_21 = arith.constant 0 : index
    %c0_22 = arith.constant 0 : index
    %37 = vector.load %arg4[%c0_20, %c0_21, %c0_22] : memref<2x8x32xf32, #tpu.memory_space<vmem>>, vector<2x8x32xf32>
    %38 = vector.broadcast %36 : vector<2x8x1xf32> to vector<2x8x32xf32>
    %39 = arith.mulf %38, %37 : vector<2x8x32xf32>
    %cst_23 = arith.constant dense<0.000000e+00> : vector<2x32xf32>
    %40 = vector.multi_reduction <add>, %39, %cst_23 [1] : vector<2x8x32xf32> to vector<2x32xf32>
    %c0_24 = arith.constant 0 : index
    %c0_25 = arith.constant 0 : index
    %41 = vector.load %arg9[%c0_24, %c0_25] : memref<16x128xf32, #tpu.memory_space<vmem>>, vector<16x128xf32>
    %cst_26 = arith.constant dense<0.000000e+00> : vector<2x128xf32>
    %42 = tpu.matmul %7, %41, %cst_26 {dimension_numbers = #tpu.dot_dimension_numbers<[1], [0], [0], [1], [0, 0, 1, 1], [], []>} : vector<2x16xf32>, vector<16x128xf32>, vector<2x128xf32> -> vector<2x128xf32>
    %c0_27 = arith.constant 0 : index
    %c0_28 = arith.constant 0 : index
    %43 = vector.load %arg10[%c0_27, %c0_28] : memref<32x128xf32, #tpu.memory_space<vmem>>, vector<32x128xf32>
    %cst_29 = arith.constant dense<0.000000e+00> : vector<2x128xf32>
    %44 = tpu.matmul %40, %43, %cst_29 {dimension_numbers = #tpu.dot_dimension_numbers<[1], [0], [0], [1], [0, 0, 1, 1], [], []>} : vector<2x32xf32>, vector<32x128xf32>, vector<2x128xf32> -> vector<2x128xf32>
    %45 = arith.addf %42, %44 : vector<2x128xf32>
    %c0_30 = arith.constant 0 : index
    %c0_31 = arith.constant 0 : index
    %c0_32 = arith.constant 0 : index
    %46 = vector.load %arg2[%c0_30, %c0_31, %c0_32] : memref<2x2x32xf32, #tpu.memory_space<vmem>>, vector<1x2x32xf32>
    %47 = vector.shape_cast %46 : vector<1x2x32xf32> to vector<2x32xf32>
    %c0_33 = arith.constant 0 : index
    %c0_34 = arith.constant 0 : index
    %c0_35 = arith.constant 0 : index
    %48 = vector.load %arg12[%c0_33, %c0_34, %c0_35] : memref<2x32x128xf32, #tpu.memory_space<vmem>>, vector<1x32x128xf32>
    %49 = vector.shape_cast %48 : vector<1x32x128xf32> to vector<32x128xf32>
    %cst_36 = arith.constant dense<0.000000e+00> : vector<2x128xf32>
    %50 = tpu.matmul %47, %49, %cst_36 {dimension_numbers = #tpu.dot_dimension_numbers<[1], [0], [0], [1], [0, 0, 1, 1], [], []>} : vector<2x32xf32>, vector<32x128xf32>, vector<2x128xf32> -> vector<2x128xf32>
    %51 = arith.addf %45, %50 : vector<2x128xf32>
    %c0_37 = arith.constant 0 : index
    %c0_38 = arith.constant 0 : index
    %c0_39 = arith.constant 0 : index
    %52 = vector.load %arg13[%c0_37, %c0_38, %c0_39] : memref<2x1x128xf32, #tpu.memory_space<vmem>>, vector<1x1x128xf32>
    %53 = vector.shape_cast %52 : vector<1x1x128xf32> to vector<1x128xf32>
    %54 = vector.broadcast %53 : vector<1x128xf32> to vector<2x128xf32>
    %55 = arith.addf %51, %54 : vector<2x128xf32>
    %56 = vector.extract_strided_slice %55 {offsets = [0, 0], sizes = [2, 32], strides = [1, 1]} : vector<2x128xf32> to vector<2x32xf32>
    %57 = arith.negf %56 : vector<2x32xf32>
    %58 = math.exp %57 : vector<2x32xf32>
    %cst_40 = arith.constant 1.000000e+00 : f32
    %59 = vector.broadcast %cst_40 : f32 to vector<2x32xf32>
    %60 = arith.addf %59, %58 : vector<2x32xf32>
    %61 = arith.divf %59, %60 : vector<2x32xf32>
    %62 = vector.extract_strided_slice %55 {offsets = [0, 32], sizes = [2, 32], strides = [1, 1]} : vector<2x128xf32> to vector<2x32xf32>
    %63 = arith.negf %62 : vector<2x32xf32>
    %64 = math.exp %63 : vector<2x32xf32>
    %cst_41 = arith.constant 1.000000e+00 : f32
    %65 = vector.broadcast %cst_41 : f32 to vector<2x32xf32>
    %66 = arith.addf %65, %64 : vector<2x32xf32>
    %67 = arith.divf %65, %66 : vector<2x32xf32>
    %68 = vector.extract_strided_slice %55 {offsets = [0, 64], sizes = [2, 32], strides = [1, 1]} : vector<2x128xf32> to vector<2x32xf32>
    %69 = math.tanh %68 : vector<2x32xf32>
    %70 = vector.extract_strided_slice %55 {offsets = [0, 96], sizes = [2, 32], strides = [1, 1]} : vector<2x128xf32> to vector<2x32xf32>
    %71 = arith.negf %70 : vector<2x32xf32>
    %72 = math.exp %71 : vector<2x32xf32>
    %cst_42 = arith.constant 1.000000e+00 : f32
    %73 = vector.broadcast %cst_42 : f32 to vector<2x32xf32>
    %74 = arith.addf %73, %72 : vector<2x32xf32>
    %75 = arith.divf %73, %74 : vector<2x32xf32>
    %c0_43 = arith.constant 0 : index
    %c0_44 = arith.constant 0 : index
    %c0_45 = arith.constant 0 : index
    %76 = vector.load %arg3[%c0_43, %c0_44, %c0_45] : memref<2x2x32xf32, #tpu.memory_space<vmem>>, vector<1x2x32xf32>
    %77 = vector.shape_cast %76 : vector<1x2x32xf32> to vector<2x32xf32>
    %78 = arith.mulf %67, %77 : vector<2x32xf32>
    %79 = arith.mulf %61, %69 : vector<2x32xf32>
    %80 = arith.addf %78, %79 : vector<2x32xf32>
    %81 = math.tanh %80 : vector<2x32xf32>
    %82 = arith.mulf %75, %81 : vector<2x32xf32>
    %c0_46 = arith.constant 0 : index
    %c0_47 = arith.constant 0 : index
    %c0_48 = arith.constant 0 : index
    %83 = vector.load %arg11[%c0_46, %c0_47, %c0_48] : memref<1x32x128xf32, #tpu.memory_space<vmem>>, vector<1x32x128xf32>
    %84 = vector.shape_cast %83 : vector<1x32x128xf32> to vector<32x128xf32>
    %cst_49 = arith.constant dense<0.000000e+00> : vector<2x128xf32>
    %85 = tpu.matmul %82, %84, %cst_49 {dimension_numbers = #tpu.dot_dimension_numbers<[1], [0], [0], [1], [0, 0, 1, 1], [], []>} : vector<2x32xf32>, vector<32x128xf32>, vector<2x128xf32> -> vector<2x128xf32>
    %c1_50 = arith.constant 1 : index
    %c0_51 = arith.constant 0 : index
    %c0_52 = arith.constant 0 : index
    %86 = vector.load %arg2[%c1_50, %c0_51, %c0_52] : memref<2x2x32xf32, #tpu.memory_space<vmem>>, vector<1x2x32xf32>
    %87 = vector.shape_cast %86 : vector<1x2x32xf32> to vector<2x32xf32>
    %c1_53 = arith.constant 1 : index
    %c0_54 = arith.constant 0 : index
    %c0_55 = arith.constant 0 : index
    %88 = vector.load %arg12[%c1_53, %c0_54, %c0_55] : memref<2x32x128xf32, #tpu.memory_space<vmem>>, vector<1x32x128xf32>
    %89 = vector.shape_cast %88 : vector<1x32x128xf32> to vector<32x128xf32>
    %cst_56 = arith.constant dense<0.000000e+00> : vector<2x128xf32>
    %90 = tpu.matmul %87, %89, %cst_56 {dimension_numbers = #tpu.dot_dimension_numbers<[1], [0], [0], [1], [0, 0, 1, 1], [], []>} : vector<2x32xf32>, vector<32x128xf32>, vector<2x128xf32> -> vector<2x128xf32>
    %91 = arith.addf %85, %90 : vector<2x128xf32>
    %c1_57 = arith.constant 1 : index
    %c0_58 = arith.constant 0 : index
    %c0_59 = arith.constant 0 : index
    %92 = vector.load %arg13[%c1_57, %c0_58, %c0_59] : memref<2x1x128xf32, #tpu.memory_space<vmem>>, vector<1x1x128xf32>
    %93 = vector.shape_cast %92 : vector<1x1x128xf32> to vector<1x128xf32>
    %94 = vector.broadcast %93 : vector<1x128xf32> to vector<2x128xf32>
    %95 = arith.addf %91, %94 : vector<2x128xf32>
    %96 = vector.extract_strided_slice %95 {offsets = [0, 0], sizes = [2, 32], strides = [1, 1]} : vector<2x128xf32> to vector<2x32xf32>
    %97 = arith.negf %96 : vector<2x32xf32>
    %98 = math.exp %97 : vector<2x32xf32>
    %cst_60 = arith.constant 1.000000e+00 : f32
    %99 = vector.broadcast %cst_60 : f32 to vector<2x32xf32>
    %100 = arith.addf %99, %98 : vector<2x32xf32>
    %101 = arith.divf %99, %100 : vector<2x32xf32>
    %102 = vector.extract_strided_slice %95 {offsets = [0, 32], sizes = [2, 32], strides = [1, 1]} : vector<2x128xf32> to vector<2x32xf32>
    %103 = arith.negf %102 : vector<2x32xf32>
    %104 = math.exp %103 : vector<2x32xf32>
    %cst_61 = arith.constant 1.000000e+00 : f32
    %105 = vector.broadcast %cst_61 : f32 to vector<2x32xf32>
    %106 = arith.addf %105, %104 : vector<2x32xf32>
    %107 = arith.divf %105, %106 : vector<2x32xf32>
    %108 = vector.extract_strided_slice %95 {offsets = [0, 64], sizes = [2, 32], strides = [1, 1]} : vector<2x128xf32> to vector<2x32xf32>
    %109 = math.tanh %108 : vector<2x32xf32>
    %110 = vector.extract_strided_slice %95 {offsets = [0, 96], sizes = [2, 32], strides = [1, 1]} : vector<2x128xf32> to vector<2x32xf32>
    %111 = arith.negf %110 : vector<2x32xf32>
    %112 = math.exp %111 : vector<2x32xf32>
    %cst_62 = arith.constant 1.000000e+00 : f32
    %113 = vector.broadcast %cst_62 : f32 to vector<2x32xf32>
    %114 = arith.addf %113, %112 : vector<2x32xf32>
    %115 = arith.divf %113, %114 : vector<2x32xf32>
    %c1_63 = arith.constant 1 : index
    %c0_64 = arith.constant 0 : index
    %c0_65 = arith.constant 0 : index
    %116 = vector.load %arg3[%c1_63, %c0_64, %c0_65] : memref<2x2x32xf32, #tpu.memory_space<vmem>>, vector<1x2x32xf32>
    %117 = vector.shape_cast %116 : vector<1x2x32xf32> to vector<2x32xf32>
    %118 = arith.mulf %107, %117 : vector<2x32xf32>
    %119 = arith.mulf %101, %109 : vector<2x32xf32>
    %120 = arith.addf %118, %119 : vector<2x32xf32>
    %121 = math.tanh %120 : vector<2x32xf32>
    %122 = arith.mulf %115, %121 : vector<2x32xf32>
    %123 = vector.shape_cast %82 : vector<2x32xf32> to vector<1x2x32xf32>
    %124 = vector.shape_cast %122 : vector<2x32xf32> to vector<1x2x32xf32>
    %125 = tpu.concatenate %123, %124 in 0 : vector<1x2x32xf32>, vector<1x2x32xf32> -> vector<2x2x32xf32>
    %c0_66 = arith.constant 0 : index
    %c0_67 = arith.constant 0 : index
    %c0_68 = arith.constant 0 : index
    %126 = vector.load %arg18[%c0_66, %c0_67, %c0_68] : memref<2x2x32xf32, #tpu.memory_space<vmem>>, vector<2x2x32xf32>
    tpu.vector_store %arg18[%c0_66, %c0_67, %c0_68], %125 {strides = array<i32>} : memref<2x2x32xf32, #tpu.memory_space<vmem>>, vector<2x2x32xf32>,
    %127 = vector.shape_cast %80 : vector<2x32xf32> to vector<1x2x32xf32>
    %128 = vector.shape_cast %120 : vector<2x32xf32> to vector<1x2x32xf32>
    %129 = tpu.concatenate %127, %128 in 0 : vector<1x2x32xf32>, vector<1x2x32xf32> -> vector<2x2x32xf32>
    %c0_69 = arith.constant 0 : index
    %c0_70 = arith.constant 0 : index
    %c0_71 = arith.constant 0 : index
    %130 = vector.load %arg19[%c0_69, %c0_70, %c0_71] : memref<2x2x32xf32, #tpu.memory_space<vmem>>, vector<2x2x32xf32>
    tpu.vector_store %arg19[%c0_69, %c0_70, %c0_71], %129 {strides = array<i32>} : memref<2x2x32xf32, #tpu.memory_space<vmem>>, vector<2x2x32xf32>,
    %c0_72 = arith.constant 0 : index
    %c0_73 = arith.constant 0 : index
    %131 = vector.load %arg14[%c0_72, %c0_73] : memref<32x64xf32, #tpu.memory_space<vmem>>, vector<32x64xf32>
    %cst_74 = arith.constant dense<0.000000e+00> : vector<2x64xf32>
    %132 = tpu.matmul %122, %131, %cst_74 {dimension_numbers = #tpu.dot_dimension_numbers<[1], [0], [0], [1], [0, 0, 1, 1], [], []>} : vector<2x32xf32>, vector<32x64xf32>, vector<2x64xf32> -> vector<2x64xf32>
    %c0_75 = arith.constant 0 : index
    %c0_76 = arith.constant 0 : index
    %133 = vector.load %arg15[%c0_75, %c0_76] : memref<32x64xf32, #tpu.memory_space<vmem>>, vector<32x64xf32>
    %cst_77 = arith.constant dense<0.000000e+00> : vector<2x64xf32>
    %134 = tpu.matmul %40, %133, %cst_77 {dimension_numbers = #tpu.dot_dimension_numbers<[1], [0], [0], [1], [0, 0, 1, 1], [], []>} : vector<2x32xf32>, vector<32x64xf32>, vector<2x64xf32> -> vector<2x64xf32>
    %135 = arith.addf %132, %134 : vector<2x64xf32>
    %c0_78 = arith.constant 0 : index
    %c0_79 = arith.constant 0 : index
    %136 = vector.load %arg16[%c0_78, %c0_79] : memref<1x64xf32, #tpu.memory_space<vmem>>, vector<1x64xf32>
    %137 = vector.broadcast %136 : vector<1x64xf32> to vector<2x64xf32>
    %138 = arith.addf %135, %137 : vector<2x64xf32>
    %c0_80 = arith.constant 0 : index
    %c0_81 = arith.constant 0 : index
    %139 = vector.load %arg17[%c0_80, %c0_81] : memref<2x64xf32, #tpu.memory_space<vmem>>, vector<2x64xf32>
    tpu.vector_store %arg17[%c0_80, %c0_81], %138 {strides = array<i32>} : memref<2x64xf32, #tpu.memory_space<vmem>>, vector<2x64xf32>,
    return
  }
}

</mosaic_0001>

<bundles_post_ra>
// kernel: decoder_forward.1
= control target key start
LH: loop header
LB: loop body
LE: loop exit
PB: predicated region body
PF: predicated region fallthrough
CT: control target
= control target key end

     0   :  { %s2194_s0 = inlined_call_operand.vmem [shape: s32[2,1], index: 0, kind: input, shape index: {}]   ;;  %s2195_s1 = inlined_call_operand.vmem [shape: f32[64,16], index: 1, kind: input, shape index: {}]   ;;  %s2196_s2 = inlined_call_operand.hbm [shape: f32[2,2,32], index: 2, kind: input, shape index: {}, may-alias: {2,18}]   ;;  %s2197_s3 = inlined_call_operand.hbm [shape: f32[2,2,32], index: 3, kind: input, shape index: {}, may-alias: {3,19}]   ;;  %s2198_s4 = inlined_call_operand.vmem [shape: f32[2,8,32], index: 4, kind: input, shape index: {}]   ;;  %s2199_s5 = inlined_call_operand.vmem [shape: f32[2,8,32], index: 5, kind: input, shape index: {}]   ;;  %s2200_s6 = inlined_call_operand.vmem [shape: f32[32,32], index: 6, kind: input, shape index: {}]   ;;  %s2201_s7 = inlined_call_operand.vmem [shape: f32[1,32], index: 7, kind: input, shape index: {}]   ;;  %s2202_s8 = inlined_call_operand.hbm [shape: f32[1,32], index: 8, kind: input, shape index: {}]   ;;  %s2203_s9 = inlined_call_operand.hbm [shape: f32[16,128], index: 9, kind: input, shape index: {}]   ;;  %s2204_s10 = inlined_call_operand.vmem [shape: f32[32,128], index: 10, kind: input, shape index: {}]   ;;  %s2205_s11 = inlined_call_operand.vmem [shape: f32[1,32,128], index: 11, kind: input, shape index: {}]   ;;  %s2206_s12 = inlined_call_operand.vmem [shape: f32[2,32,128], index: 12, kind: input, shape index: {}]   ;;  %s2207_s13 = inlined_call_operand.vmem [shape: f32[2,1,128], index: 13, kind: input, shape index: {}]   ;;  %s2208_s14 = inlined_call_operand.hbm [shape: f32[32,64], index: 14, kind: input, shape index: {}]   ;;  %s2209_s15 = inlined_call_operand.hbm [shape: f32[32,64], index: 15, kind: input, shape index: {}]   ;;  %s2210_s16 = inlined_call_operand.vmem [shape: f32[1,64], index: 16, kind: input, shape index: {}]   ;;  %s2211_s17 = inlined_call_operand.hbm [shape: f32[2,64], index: 17, kind: output, shape index: {0}]   ;;  %s2212_s18 = inlined_call_operand.hbm [shape: f32[2,2,32], index: 18, kind: output, shape index: {1}, may-alias: {2,18}]   ;;  %s2213_s19 = inlined_call_operand.hbm [shape: f32[2,2,32], index: 19, kind: output, shape index: {2}, may-alias: {3,19}]   ;;  %s2214_s20 = inlined_call_operand.hbm [shape: f32[2,8], index: 20, kind: output, shape index: {3}]  }
   0x1   :  { %2224 = sst [smem:[#allocation26_spill]] %s2194_s0 }
   0x2   :  { %2225 = sst [smem:[#allocation27_spill]] %s2195_s1 }
   0x3   :  { %2226 = sst [smem:[#allocation28_spill]] %s2196_s2 }
   0x4   :  { %2227 = sst [smem:[#allocation29_spill]] %s2197_s3 }
   0x5   :  { %2228 = sst [smem:[#allocation30_spill]] %s2198_s4 }
   0x6   :  { %2229 = sst [smem:[#allocation31_spill]] %s2210_s16 }
   0x7   :  { %2230 = sst [smem:[#allocation32_spill]] %s2211_s17 }
   0x8   :  { %26 = vsyncpa [#allocation3], 0 }
   0x9   :  { %27 = vsyncpa [#allocation6], 0 }
   0xa   :  { %28 = vsyncpa [#allocation9], 0 }
   0xb   :  { %29 = vsyncpa [#allocation12], 0 }
   0xc   :  { %30 = vsyncpa [#allocation4], 0 }
   0xd   :  { %31 = vsyncpa [#allocation15], 0 }
   0xe   :  { %32 = vsyncpa [#allocation18], 0  ;;  %s1709_s1 = smov [#allocation5]   ;;  %s1710_s23 = smov [#allocation8]  }
   0xf   :  { %s54_s22 = sshll.u32 %s1709_s1, 4  ;;  %s84_s24 = sshll.u32 %s1710_s23, 4  ;;  %s55_s22 = int_to_ptr.vmem [resolvable:$true] %s54_s22  ;;  %s1835_s24 = int_to_ptr.vmem [resolvable:$true] %s84_s24 }
  0x10   :  { %s2231_s3 = sld [smem:[#allocation29_spill]] }
  0x16   :  { %s1475_s26 = scalar_lea.hbm %s2231_s3, 64 }
  0x17   :  { %p1476_p0 = scmp.ne.s32.totalorder %s2231_s3, %s1475_s26  ;;  %p1479_p1 = scmp.lt.u32.totalorder %s1475_s26, %s2231_s3 }
  0x19   :  { %p1481_p2 = pnand %p1479_p1, %p1476_p0 }
  0x1b   :  { %1484 = shalt.err (!%p1481_p2)
}
  0x1c   :  { %s1485_s30 = scalar_lea.vmem %s55_s22, 64  ;;  %p1490_p4 = scmp.lt.s32.totalorder %s55_s22, %s55_s22 }
  0x1d   :  { %p1486_p3 = scmp.ne.s32.totalorder %s55_s22, %s1485_s30  ;;  %p1491_p5 = scmp.lt.s32.totalorder %s1485_s30, %s1485_s30 }
  0x1f   :  { %p1492_p6 = por %p1491_p5, %p1490_p4 }
  0x21   :  { %p1493_p7 = pnand %p1492_p6, %p1486_p3 }
  0x23   :  { %1496 = shalt.err (!%p1493_p7)
}
  0x24   :  { %s2219_s0 = smov 32   ;;  %s2221_s21 = smov 2  }
  0x25   :  { %60 = dma.hbm_to_vmem [thread:$0]  %s2231_s3, 64, %s55_s22, [#allocation6], %s2219_s0, %s2219_s0, %s2221_s21  }
  0x26   :  { %s1497_s26 = scalar_lea.hbm %s2203_s9, 256 }
  0x27   :  { %p1498_p8 = scmp.ne.s32.totalorder %s2203_s9, %s1497_s26  ;;  %p1501_p9 = scmp.lt.u32.totalorder %s1497_s26, %s2203_s9 }
  0x29   :  { %p1503_p10 = pnand %p1501_p9, %p1498_p8 }
  0x2b   :  { %1506 = shalt.err (!%p1503_p10)
}
  0x2c   :  { %s1507_s30 = scalar_lea.vmem %s1835_s24, 256  ;;  %p1512_p12 = scmp.lt.s32.totalorder %s1835_s24, %s1835_s24 }
  0x2d   :  { %p1508_p11 = scmp.ne.s32.totalorder %s1835_s24, %s1507_s30  ;;  %p1513_p13 = scmp.lt.s32.totalorder %s1507_s30, %s1507_s30 }
  0x2f   :  { %p1514_p0 = por %p1513_p13, %p1512_p12 }
  0x31   :  { %p1515_p1 = pnand %p1514_p0, %p1508_p11 }
  0x33   :  { %1518 = shalt.err (!%p1515_p1)
}
  0x34   :  { %s1713_s22 = smov 128   ;;  %s1714_s3 = smov 8  }
  0x35   :  { %90 = dma.hbm_to_vmem [thread:$0]  %s2203_s9, 256, %s1835_s24, [#allocation9], %s1713_s22, %s1713_s22, %s1714_s3  }
  0x36   :  { %s1715_s2 = smov [#allocation2]   ;;  %s1716_s26 = smov [#allocation7]  }
  0x37   :  { %s42_s25 = sshll.u32 %s1715_s2, 4  ;;  %s75_s27 = sshll.u32 %s1716_s26, 4  ;;  %s43_s25 = int_to_ptr.vmem [resolvable:$true] %s42_s25  ;;  %s76_s27 = int_to_ptr.vmem [resolvable:$true] %s75_s27 }
  0x38   :  { %s2232_s29 = sld [smem:[#allocation28_spill]] }
  0x3e   :  { %s1519_s30 = scalar_lea.hbm %s2232_s29, 64 }
  0x3f   :  { %p1520_p2 = scmp.ne.s32.totalorder %s2232_s29, %s1519_s30  ;;  %p1523_p3 = scmp.lt.u32.totalorder %s1519_s30, %s2232_s29 }
  0x41   :  { %p1525_p4 = pnand %p1523_p3, %p1520_p2 }
  0x43   :  { %1528 = shalt.err (!%p1525_p4)
}
  0x44   :  { %s1529_s9 = scalar_lea.vmem %s43_s25, 64  ;;  %p1534_p6 = scmp.lt.s32.totalorder %s43_s25, %s43_s25 }
  0x45   :  { %p1530_p5 = scmp.ne.s32.totalorder %s43_s25, %s1529_s9  ;;  %p1535_p7 = scmp.lt.s32.totalorder %s1529_s9, %s1529_s9 }
  0x47   :  { %p1536_p8 = por %p1535_p7, %p1534_p6 }
  0x49   :  { %p1537_p9 = pnand %p1536_p8, %p1530_p5 }
  0x4b   :  { %1540 = shalt.err (!%p1537_p9)
}
  0x4c   :  { %s2233_s24 = smov 2   ;;  %s2234_s1 = smov 32  }
  0x4d   :  { %48 = dma.hbm_to_vmem [thread:$0]  %s2232_s29, 64, %s43_s25, [#allocation3], %s2234_s1, %s2234_s1, %s2233_s24  }
  0x4e   :  { %s1541_s16 = scalar_lea.hbm %s2202_s8, 16 }
  0x4f   :  { %p1542_p10 = scmp.ne.s32.totalorder %s2202_s8, %s1541_s16  ;;  %p1545_p11 = scmp.lt.u32.totalorder %s1541_s16, %s2202_s8 }
  0x51   :  { %p1547_p12 = pnand %p1545_p11, %p1542_p10 }
  0x53   :  { %1550 = shalt.err (!%p1547_p12)
}
  0x54   :  { %s1551_s30 = scalar_lea.vmem %s76_s27, 16  ;;  %s1555_s9 = scalar_lea.vmem %s76_s27, 32 }
  0x55   :  { %p1552_p13 = scmp.ne.s32.totalorder %s76_s27, %s1551_s30  ;;  %p1556_p0 = scmp.lt.s32.totalorder %s76_s27, %s76_s27 }
  0x56   :  { %p1557_p1 = scmp.lt.s32.totalorder %s1555_s9, %s1551_s30 }
  0x58   :  { %p1558_p2 = por %p1557_p1, %p1556_p0 }
  0x5a   :  { %p1559_p3 = pnand %p1558_p2, %p1552_p13 }
  0x5c   :  { %1562 = shalt.err (!%p1559_p3)
}
  0x5d   :  { %78 = dma.hbm_to_vmem [thread:$0]  %s2202_s8, 16, %s76_s27, [#allocation6]  }
  0x5e   :  { %s1717_s23 = smov [#allocation10]   ;;  %s1718_s0 = smov [#allocation11]  }
  0x5f   :  { %s104_s2 = sshll.u32 %s1717_s23, 4  ;;  %s116_s21 = sshll.u32 %s1718_s0, 4  ;;  %s105_s2 = int_to_ptr.vmem [resolvable:$true] %s104_s2  ;;  %s1899_s21 = int_to_ptr.vmem [resolvable:$true] %s116_s21 }
  0x60   :  { %s1563_s26 = scalar_lea.hbm %s2208_s14, 512 }
  0x61   :  { %p1564_p4 = scmp.ne.s32.totalorder %s2208_s14, %s1563_s26  ;;  %p1567_p5 = scmp.lt.u32.totalorder %s1563_s26, %s2208_s14 }
  0x63   :  { %p1569_p6 = pnand %p1567_p5, %p1564_p4 }
  0x65   :  { %1572 = shalt.err (!%p1569_p6)
}
  0x66   :  { %s1573_s8 = scalar_lea.vmem %s105_s2, 512  ;;  %p1578_p8 = scmp.lt.s32.totalorder %s105_s2, %s105_s2 }
  0x67   :  { %p1574_p7 = scmp.ne.s32.totalorder %s105_s2, %s1573_s8  ;;  %p1579_p9 = scmp.lt.s32.totalorder %s1573_s8, %s1573_s8 }
  0x69   :  { %p1580_p10 = por %p1579_p9, %p1578_p8 }
  0x6b   :  { %p1581_p11 = pnand %p1580_p10, %p1574_p7 }
  0x6d   :  { %1584 = shalt.err (!%p1581_p11)
}
  0x6e   :  { %110 = dma.hbm_to_vmem [thread:$0]  %s2208_s14, 512, %s105_s2, [#allocation9], %s1713_s22, %s1713_s22, %s1714_s3  }
  0x6f   :  { %s1585_s0 = scalar_lea.hbm %s2209_s15, 512 }
  0x70   :  { %p1586_p12 = scmp.ne.s32.totalorder %s2209_s15, %s1585_s0  ;;  %p1589_p13 = scmp.lt.u32.totalorder %s1585_s0, %s2209_s15 }
  0x72   :  { %p1591_p0 = pnand %p1589_p13, %p1586_p12 }
  0x74   :  { %1594 = shalt.err (!%p1591_p0)
}
  0x75   :  { %s1595_s4 = scalar_lea.vmem %s1899_s21, 512  ;;  %p1600_p2 = scmp.lt.s32.totalorder %s1899_s21, %s1899_s21 }
  0x76   :  { %p1596_p1 = scmp.ne.s32.totalorder %s1899_s21, %s1595_s4  ;;  %p1601_p3 = scmp.lt.s32.totalorder %s1595_s4, %s1595_s4 }
  0x78   :  { %p1602_p4 = por %p1601_p3, %p1600_p2 }
  0x7a   :  { %p1603_p5 = pnand %p1602_p4, %p1596_p1 }
  0x7c   :  { %1606 = shalt.err (!%p1603_p5)
}
  0x7d   :  { %122 = dma.hbm_to_vmem [thread:$0]  %s2209_s15, 512, %s1899_s21, [#allocation12], %s1713_s22, %s1713_s22, %s1714_s3  }
  0x7e   :  { %1695 = dma.done.wait [#allocation3], 64  }
  0x7f   :  { %1696 = vsyncadd [#allocation3], 4294967232 }
  0x80   :  { %1697 = dma.done.wait [#allocation6], 80  }
  0x81   :  { %1698 = vsyncadd [#allocation6], 4294967216 }
  0x82   :  { %1699 = dma.done.wait [#allocation9], 768  }
  0x83   :  { %1700 = vsyncadd [#allocation9], 4294966528 }
  0x84   :  { %1701 = dma.done.wait [#allocation12], 512  }
  0x85   :  { %1702 = vsyncadd [#allocation12], 4294966784  ;;  %v1719_v0 = vmov 0.0|0.0   ;;  %vm1720_vm0 = vmmov 0   ;;  %v1721_v1 = vmov 0.0   ;;  %v236_v2 = vld [vmem:[%s2200_s6] sm:$0xff]  ;;  %v144_v9 = vlaneseq }
  0x86   :  { %1379 = vmatprep.subr.bf16.mxu1 %v1719_v0  ;;  %1291 = vmatprep.mubr.msk.f32.mxu1 %vm1720_vm0, %v1721_v1  ;;  %v237_v3 = vld [vmem:[%s2200_s6 + $0x8] sm:$0xff]  ;;  %v238_v4 = vld [vmem:[%s2200_s6 + $0x10] sm:$0xff]  ;;  %v239_v6 = vld [vmem:[%s2200_s6 + $0x18] sm:$0xff]  ;;  %vm240_vm1 = vcmask 261120   ;;  %v1722_v10 = vmov 1966171168  }
  0x87   :  { %1367 = vmatprep.subr.bf16.mxu0 %v1719_v0  ;;  %1280 = vmatprep.mubr.msk.f32.mxu0 %vm1720_vm0, %v1721_v1  ;;  %v1380_v5 = vpack.c.bf16 %v237_v3, %v236_v2  ;;  %v1383_v7 = vpack.c.bf16 %v239_v6, %v238_v4  ;;  %v235_v8 = vld [vmem:[#allocation2 + $0x2] sm:$0x3]  ;;  %v318_v11 = vunpack.c.l.s4 %v1722_v10  ;;  %v1959_v13 = vshrl.u32 %v144_v9, 7  ;;  %v315_v24 = vld [vmem:[%s2199_s5 + $0x8] sm:$0xff]  ;;  %v1198_v25 = vld [vmem:[%s2201_s7] ss:$0 sm:$0xff] }
  0x88   :  { %v314_v21 = vld [vmem:[%s2199_s5] sm:$0xff]  ;;  %v1199_v31 = vld [vmem:[#allocation7] ss:$0 sm:$0xff]  ;;  %v145_v38 = vand.u32 127, %v144_v9  ;;  %vm387_vm2 = vcmask 1041409   ;;  %vm390_vm3 = vcmask 58368  }
  0x89   :  { %1381 = vmatpush3.bf16.msra.mxu1 %v1380_v5  ;;  %v319_v12 = vunpack.c.0.s8 %v318_v11  ;;  %v1963_v17 = vsub.s32 0, %v1959_v13  ;;  %s2235_s17 = sld [smem:[#allocation26_spill]]  ;;  %v1723_v47 = vmov 0   ;;  %s2236_s4 = sld [smem:[#allocation27_spill]]  ;;  %v401_v60 = vsub.s32 1, %v1959_v13 }
  0x8a   :  { %1382 = vmatprep.subr.bf16.mxu1 %v1719_v0  ;;  %v1979_v40 = vsub.s32 %v145_v38, %v1959_v13  ;;  %1445 = vset.pattern.permute.xlu1 %v1723_v47  ;;  %vm160_vm4 = vcmask 523264   ;;  %vm567_vm6 = vcmask 130048   ;;  %vm959_vm7 = vcmask 254976   ;;  %s1726_s27 = smov [#allocation14]  }
  0x8b   :  { %v322_v14 = vsub.s32 %v319_v12, %v1959_v13  ;;  %1446 = vset.pattern.permute.xlu0 %v1723_v47 }
  0x8d   :  { %1384 = vmatpush3.bf16.msra.mxu1 %v1383_v7 }
  0x8e   :  { %1385 = vmatprep.subr.bf16.mxu1 %v1719_v0 }
  0x8f   :  { %v143_v46 = vld [vmem:[%s2235_s17] sm:$0x3]  ;;  %v153_v49 = vld [vmem:[%s2236_s4 + $0x8] sm:$0xff]  ;;  %v154_v50 = vld [vmem:[%s2236_s4 + $0x10] sm:$0xff] }
  0x90   :  { %1292 = vmatmul.mubr.msk.f32.vlgmr.msra.gmra.mrb[0].mxu1 %vm240_vm1, %v235_v8  ;;  %v152_v48 = vld [vmem:[%s2236_s4] sm:$0xff]  ;;  %v155_v52 = vld [vmem:[%s2236_s4 + $0x18] sm:$0xff]  ;;  %v157_v55 = vld [vmem:[%s2236_s4 + $0x28] sm:$0xff] }
  0x91   :  { %1302 = vmatprep.mubr.msk.f32.mxu1 %vm1720_vm0, %v1721_v1  ;;  %v1368_v51 = vpack.c.bf16 %v153_v49, %v152_v48  ;;  %v1371_v53 = vpack.c.bf16 %v155_v52, %v154_v50  ;;  %v156_v54 = vld [vmem:[%s2236_s4 + $0x20] sm:$0xff]  ;;  %v158_v57 = vld [vmem:[%s2236_s4 + $0x30] sm:$0xff]  ;;  %v159_v58 = vld [vmem:[%s2236_s4 + $0x38] sm:$0xff]  ;;  %s1724_s4 = smov 64  }
  0x92   :  { %v1374_v56 = vpack.c.bf16 %v157_v55, %v156_v54  ;;  %v1377_v59 = vpack.c.bf16 %v159_v58, %v158_v57  ;;  %v735_v48 = vld [vmem:[#allocation5] sm:$0x3] }
  0x93   :  { %1369 = vmatpush3.bf16.msra.mxu0 %v1368_v51 }
  0x94   :  { %1370 = vmatprep.subr.bf16.mxu0 %v1719_v0 }
  0x97   :  { %1372 = vmatpush3.bf16.msra.mxu0 %v1371_v53 }
  0x98   :  { %1373 = vmatprep.subr.bf16.mxu0 %v1719_v0 }
  0x9b   :  { %1375 = vmatpush3.bf16.msra.mxu0 %v1374_v56 }
  0x9c   :  { %1376 = vmatprep.subr.bf16.mxu0 %v1719_v0 }
  0x9f   :  { %1378 = vmatpush3.bf16.msra.mxu0 %v1377_v59 }
  0xa0   :  { %1391 = vmatprep.subr.bf16.mxu0 %v1719_v0 }
 0x163   :  { %v310_v15 = vpop.f32.mrb[0].mxu1 }
 0x164   :  { %v323_v16 = vrot.slane %v310_v15, %v322_v14  ;;  %v1293_v18 = vpop.f32.mrb[1].mxu1 }
 0x165   :  { %v487_v18 = vld [vmem:[#allocation8 + $0x8] sm:$0xff] }
 0x166   :  { %v324_v19 = vcombine.high %v323_v16, %v323_v16  ;;  %v331_v20 = vrot.slane %v323_v16, %v322_v14  ;;  %v486_v16 = vld [vmem:[#allocation8] sm:$0xff] }
 0x168   :  { %v338_v22 = vrot.slane %v324_v19, %v322_v14  ;;  %v342_v23 = vrot.slane %v331_v20, %v1963_v17  ;;  %v1392_v19 = vpack.c.bf16 %v487_v18, %v486_v16 }
 0x16a   :  { %v346_v26 = vrot.slane %v338_v22, %v1963_v17  ;;  %v349_v27 = vadd.f32 %v342_v23, %v314_v21 }
 0x16c   :  { %v350_v28 = vadd.f32 %v346_v26, %v315_v24  ;;  %v358_v29 = vadd.f32 %v1198_v25, %v349_v27 }
 0x16e   :  { %v359_v30 = vadd.f32 %v1198_v25, %v350_v28  ;;  %1447 = vtanh.f32 %v358_v29  ;;  %v1205_v29 = vld [vmem:[%s2206_s12 + $0x20] sm:$0xff] }
 0x170   :  { %1449 = vtanh.f32 %v359_v30  ;;  %v1206_v30 = vld [vmem:[%s2206_s12 + $0x28] sm:$0xff] }
 0x178   :  { %v1448_v32 = vpop.eup %1447 }
 0x179   :  { %v369_v33 = vmul.f32 %v1448_v32, %v1199_v31  ;;  %v1208_v32 = vld [vmem:[%s2206_s12 + $0x38] sm:$0xff] }
 0x17a   :  { %v1450_v34 = vpop.eup %1449 }
 0x17b   :  { %v371_v35 = vsel %vm240_vm1, %v369_v33, 0.0  ;;  %v370_v36 = vmul.f32 %v1450_v34, %v1199_v31  ;;  %v1401_v31 = vpack.c.bf16 %v1206_v30, %v1205_v29  ;;  %v488_v34 = vld [vmem:[%s2204_s10] sm:$0xff] }
 0x17c   :  { %372 = vadd.xlane.f32.xlu0 %v371_v35  ;;  %v489_v35 = vld [vmem:[%s2204_s10 + $0x8] sm:$0xff] }
 0x17d   :  { %v374_v37 = vsel %vm240_vm1, %v370_v36, 0.0  ;;  %v1386_v36 = vpack.c.bf16 %v489_v35, %v488_v34 }
 0x17f   :  { %1387 = vmatpush3.bf16.msra.mxu1 %v1386_v36 }
 0x180   :  { %375 = vadd.xlane.f32.xlu0 %v374_v37  ;;  %v976_v37 = vld [vmem:[#allocation11] sm:$0xff]  ;;  %1388 = vmatprep.subr.bf16.mxu1 %v1719_v0 }
 0x209   :  { %v373_v39 = vpop.xlane.xlu0 %372 }
 0x20a   :  { %v382_v42 = vrot.slane %v373_v39, %v1979_v40 }
 0x20d   :  { %v376_v41 = vpop.xlane.xlu0 %375 }
 0x20e   :  { %v386_v43 = vrot.slane %v376_v41, %v1979_v40 }
 0x210   :  { %v388_v44 = vsel %vm387_vm2, %v386_v43, %v382_v42  ;;  %v490_v42 = vld [vmem:[%s2204_s10 + $0x10] sm:$0xff]  ;;  %v491_v43 = vld [vmem:[%s2204_s10 + $0x18] sm:$0xff]  ;;  %s2237_s10 = sld [smem:[#allocation30_spill]] }
 0x211   :  { %v391_v45 = vsel %vm390_vm3, %v388_v44, -inf  ;;  %v1389_v44 = vpack.c.bf16 %v491_v43, %v490_v42  ;;  %v757_v43 = vld [vmem:[%s2205_s11] sm:$0xff] }
 0x212   :  { %392 = vmax.xlane.f32.xlu1 %v391_v45  ;;  %v978_v45 = vld [vmem:[#allocation11 + $0x10] sm:$0xff] }
 0x213   :  { %1390 = vmatpush3.bf16.msra.mxu1 %v1389_v44  ;;  %v758_v44 = vld [vmem:[%s2205_s11 + $0x8] sm:$0xff] }
 0x214   :  { %1394 = vmatprep.subr.bf16.mxu1 %v1719_v0 }
 0x216   :  { %v466_v49 = vld [vmem:[%s2237_s10] sm:$0xff]  ;;  %v467_v54 = vld [vmem:[%s2237_s10 + $0x8] sm:$0xff]  ;;  %s1147_s10 = sshll.u32 %s1726_s27, 4  ;;  %s1148_s10 = int_to_ptr.vmem [resolvable:$true] %s1147_s10 }
 0x217   :  { %s1607_s6 = scalar_lea.vmem %s1148_s10, 64  ;;  %p1612_p7 = scmp.lt.s32.totalorder %s1148_s10, %s1148_s10 }
 0x218   :  { %p1608_p6 = scmp.ne.s32.totalorder %s1148_s10, %s1607_s6  ;;  %p1613_p8 = scmp.lt.s32.totalorder %s1607_s6, %s1607_s6 }
 0x21a   :  { %p1614_p9 = por %p1613_p8, %p1612_p7 }
 0x21c   :  { %p1615_p10 = pnand %p1614_p9, %p1608_p6 }
 0x223   :  { %147 = vperm.xlu1 %1445, %v143_v46   ;;  %v979_v46 = vld [vmem:[#allocation11 + $0x18] sm:$0xff] }
 0x224   :  { %v1416_v47 = vpack.c.bf16 %v979_v46, %v978_v45  ;;  %v759_v45 = vld [vmem:[%s2205_s11 + $0x10] sm:$0xff]  ;;  %v1407_v46 = vpack.c.bf16 %v758_v44, %v757_v43 }
 0x29f   :  { %v393_v61 = vpop.xlane.xlu1 %392 }
 0x2a0   :  { %v398_v62 = vrot.slane %v393_v61, %v1963_v17  ;;  %v402_v63 = vrot.slane %v393_v61, %v401_v60 }
 0x2a2   :  { %v405_v2 = vsub.f32 %v373_v39, %v398_v62  ;;  %v406_v3 = vsub.f32 %v376_v41, %v402_v63  ;;  %v761_v41 = vld [vmem:[#allocation2 + $0x2] sm:$0x3] }
 0x2a3   :  { %v148_v6 = vpop.permute.xlu1 %147 }
 0x2a4   :  { %v407_v4 = vmul.f32 1.442695, %v405_v2  ;;  %v409_v5 = vmul.f32 1.442695, %v406_v3  ;;  %vm149_vm5 = vcmp.eq.s32.totalorder %v145_v38, %v148_v6  ;;  %v977_v38 = vld [vmem:[#allocation11 + $0x8] sm:$0xff] }
 0x2a5   :  { %v1195_v7 = vsel %vm149_vm5, 1.0, %v1721_v1  ;;  %v1413_v39 = vpack.c.bf16 %v977_v38, %v976_v37 }
 0x2a6   :  { %1451 = vpow2.f32 %v407_v4  ;;  %1281 = vmatmul.mubr.msk.f32.vlgmr.msra.gmra.mrb[0].mxu0 %vm160_vm4, %v1195_v7 }
 0x2a7   :  { %1453 = vpow2.f32 %v409_v5  ;;  %1309 = vmatprep.mubr.msk.f32.mxu0 %vm1720_vm0, %v1721_v1  ;;  %1393 = vmatpush3.bf16.msra.mxu0 %v1392_v19  ;;  %v641_v19 = vld [vmem:[#allocation2] sm:$0x3] }
 0x2a8   :  { %1400 = vmatprep.subr.bf16.mxu0 %v1719_v0 }
 0x2b0   :  { %v1452_v8 = vpop.eup %1451 }
 0x2b1   :  { %v1454_v9 = vpop.eup %1453  ;;  %414 = vperm.xlu0 %1446, %v1452_v8  }
 0x2b2   :  { %417 = vperm.xlu1 %1445, %v1454_v9  }
 0x330   :  { %v415_v10 = vpop.permute.xlu0 %414 }
 0x331   :  { %v422_v11 = vrot.slane %v415_v10, %v1979_v40  ;;  %v418_v12 = vpop.permute.xlu1 %417 }
 0x332   :  { %v426_v13 = vrot.slane %v418_v12, %v1979_v40 }
 0x334   :  { %v427_v14 = vsel %vm387_vm2, %v426_v13, %v422_v11 }
 0x335   :  { %v429_v15 = vsel %vm390_vm3, %v427_v14, 0.0  ;;  %v644_v14 = vld [vmem:[%s2206_s12 + $0x10] sm:$0xff] }
 0x336   :  { %430 = vadd.xlane.f32.xlu1 %v429_v15  ;;  %v645_v15 = vld [vmem:[%s2206_s12 + $0x18] sm:$0xff] }
 0x337   :  { %v1398_v18 = vpack.c.bf16 %v645_v15, %v644_v14 }
 0x347   :  { %737 = vrot.lane.b32.xlu1 %v735_v48, %s2234_s1 }
 0x379   :  { %v230_v20 = vpop.f32.mrb[0].mxu0 }
 0x37a   :  { %v1282_v21 = vpop.f32.mrb[1].mxu0  ;;  %1310 = vmatmul.mubr.msk.f32.vlgmr.msra.gmra.mrb[2].mxu0 %vm567_vm6, %v230_v20 }
 0x37b   :  { %1331 = vmatprep.mubr.msk.f32.mxu0 %vm1720_vm0, %v1721_v1  ;;  %1402 = vmatpush3.bf16.msra.mxu0 %v1401_v31 }
 0x37c   :  { %1403 = vmatprep.subr.bf16.mxu0 %v1719_v0 }
 0x3c3   :  { %v431_v22 = vpop.xlane.xlu1 %430 }
 0x3c4   :  { %v436_v23 = vrot.slane %v431_v22, %v1963_v17  ;;  %v440_v24 = vrot.slane %v431_v22, %v401_v60  ;;  %v1207_v17 = vld [vmem:[%s2206_s12 + $0x30] sm:$0xff] }
 0x3c5   :  { %v1404_v33 = vpack.c.bf16 %v1208_v32, %v1207_v17 }
 0x3c6   :  { %1455 = vrcp.f32 %v436_v23 }
 0x3c7   :  { %1457 = vrcp.f32 %v440_v24  ;;  %1405 = vmatpush3.bf16.msra.mxu0 %v1404_v33  ;;  %v738_v38 = vpop.permute.xlu1 %737 }
 0x3c8   :  { %1412 = vmatprep.subr.bf16.mxu0 %v1719_v0 }
 0x3ca   :  { %1332 = vmatmul.mubr.msk.f32.vlgmr.msra.gmra.mrb[4].mxu0 %vm240_vm1, %v761_v41 }
 0x3cb   :  { %1414 = vmatpush3.bf16.msra.mxu0 %v1413_v39  ;;  %1353 = vmatprep.mubr.msk.f32.mxu0 %vm1720_vm0, %v1721_v1 }
 0x3cc   :  { %1415 = vmatprep.subr.bf16.mxu0 %v1719_v0 }
 0x3cf   :  { %1417 = vmatpush3.bf16.msra.mxu0 %v1416_v47  ;;  %v760_v47 = vld [vmem:[%s2205_s11 + $0x18] sm:$0xff] }
 0x3d0   :  { %v1456_v25 = vpop.eup %1455  ;;  %v1410_v48 = vpack.c.bf16 %v760_v47, %v759_v45 }
 0x3d1   :  { %v444_v26 = vmul.f32 %v1456_v25, %v1452_v8  ;;  %v1458_v27 = vpop.eup %1457 }
 0x3d2   :  { %v446_v28 = vmul.f32 %v1458_v27, %v1454_v9  ;;  %v642_v9 = vld [vmem:[%s2206_s12] sm:$0xff] }
 0x3d3   :  { %450 = vperm.xlu0 %1446, %v444_v26  }
 0x3d7   :  { %453 = vperm.xlu0 %1446, %v446_v28   ;;  %v1203_v28 = vld [vmem:[%s2207_s13] ss:$0 sm:$0xff] }
 0x44d   :  { %v637_v51 = vpop.f32.mrb[2].mxu0 }
 0x44e   :  { %v1311_v53 = vpop.f32.mrb[3].mxu0 }
 0x452   :  { %v451_v50 = vpop.permute.xlu0 %450 }
 0x453   :  { %v470_v52 = vmul.f32 %v466_v49, %v451_v50  ;;  %v458_v58 = vrot.slane %v451_v50, %v1979_v40  ;;  %v932_v50 = vld [vmem:[#allocation5 + $0x2] sm:$0x3] }
 0x454   :  { %934 = vrot.lane.b32.xlu1 %v932_v50, %s2234_s1 }
 0x455   :  { %v472_v55 = vsel %vm240_vm1, %v470_v52, 0.0 }
 0x456   :  { %v473_v56 = vrot.slane %v472_v55, 4  ;;  %v454_v57 = vpop.permute.xlu0 %453 }
 0x457   :  { %v462_v59 = vrot.slane %v454_v57, %v1979_v40  ;;  %v471_v60 = vmul.f32 %v467_v54, %v454_v57  ;;  %v643_v40 = vld [vmem:[%s2206_s12 + $0x8] sm:$0xff] }
 0x458   :  { %v474_v61 = vadd.f32 %v473_v56, %v472_v55  ;;  %v1395_v13 = vpack.c.bf16 %v643_v40, %v642_v9  ;;  %v1212_v55 = vld [vmem:[%s2207_s13 + $0x1] ss:$0 sm:$0xff]  ;;  %v974_v9 = vld [vmem:[#allocation10 + $0x10] sm:$0xff]  ;;  %s1725_s13 = smov 96  }
 0x459   :  { %v479_v62 = vsel %vm240_vm1, %v471_v60, 0.0  ;;  %v463_v63 = vsel %vm387_vm2, %v462_v59, %v458_v58 }
 0x45a   :  { %v475_v2 = vrot.slane %v474_v61, 2  ;;  %v480_v3 = vrot.slane %v479_v62, 4  ;;  %465 = vst.msk [vmem:[#allocation17] sm:$0x3] %vm390_vm3, %v463_v63 }
 0x45c   :  { %v476_v4 = vadd.f32 %v475_v2, %v474_v61  ;;  %v481_v5 = vadd.f32 %v480_v3, %v479_v62 }
 0x45e   :  { %v482_v6 = vrot.slane %v481_v5, 2  ;;  %v477_v7 = vrot.slane %v476_v4, 1 }
 0x460   :  { %v483_v8 = vadd.f32 %v482_v6, %v481_v5  ;;  %v478_v11 = vadd.f32 %v477_v7, %v476_v4  ;;  %v972_v7 = vld [vmem:[#allocation10] sm:$0xff] }
 0x462   :  { %v484_v10 = vrot.slane %v483_v8, 1 }
 0x464   :  { %v485_v12 = vadd.f32 %v484_v10, %v483_v8  ;;  %v973_v8 = vld [vmem:[#allocation10 + $0x8] sm:$0xff]  ;;  %v975_v10 = vld [vmem:[#allocation10 + $0x18] sm:$0xff] }
 0x465   :  { %v1419_v40 = vpack.c.bf16 %v973_v8, %v972_v7 }
 0x466   :  { %v494_v16 = vsel %vm387_vm2, %v485_v12, %v478_v11  ;;  %v1422_v11 = vpack.c.bf16 %v975_v10, %v974_v9 }
 0x467   :  { %1303 = vmatmul.mubr.msk.f32.vlgmr.msra.gmra.mrb[2].mxu1 %vm240_vm1, %v494_v16  ;;  %1354 = vmatmul.mubr.msk.f32.vlgmr.msra.gmra.mrb[6].mxu0 %vm240_vm1, %v494_v16 }
 0x468   :  { %1396 = vmatpush3.bf16.msra.mxu1 %v1395_v13  ;;  %1320 = vmatprep.mubr.msk.f32.mxu1 %vm1720_vm0, %v1721_v1 }
 0x469   :  { %1397 = vmatprep.subr.bf16.mxu1 %v1719_v0 }
 0x46c   :  { %1399 = vmatpush3.bf16.msra.mxu1 %v1398_v18 }
 0x46d   :  { %1406 = vmatprep.subr.bf16.mxu1 %v1719_v0 }
 0x46f   :  { %1321 = vmatmul.mubr.msk.f32.vlgmr.msra.gmra.mrb[4].mxu1 %vm240_vm1, %v641_v19 }
 0x470   :  { %1342 = vmatprep.mubr.msk.f32.mxu1 %vm1720_vm0, %v1721_v1  ;;  %1408 = vmatpush3.bf16.msra.mxu1 %v1407_v46 }
 0x471   :  { %1409 = vmatprep.subr.bf16.mxu1 %v1719_v0 }
 0x474   :  { %1411 = vmatpush3.bf16.msra.mxu1 %v1410_v48 }
 0x475   :  { %1418 = vmatprep.subr.bf16.mxu1 %v1719_v0 }
 0x49d   :  { %v836_v20 = vpop.f32.mrb[4].mxu0 }
 0x49e   :  { %v1333_v21 = vpop.f32.mrb[5].mxu0 }
 0x4c6   :  { %v935_v3 = vpop.permute.xlu1 %934 }
 0x53a   :  { %v563_v22 = vpop.f32.mrb[2].mxu1  ;;  %v2096_v23 = vpop.f32.mrb[6].mxu0 }
 0x53b   :  { %v638_v24 = vadd.f32 %v637_v51, %v563_v22  ;;  %v1304_v25 = vpop.f32.mrb[3].mxu1  ;;  %v1355_v26 = vpop.f32.mrb[7].mxu0 }
 0x542   :  { %v715_v27 = vpop.f32.mrb[4].mxu1 }
 0x543   :  { %v719_v29 = vadd.f32 %v715_v27, %v638_v24  ;;  %v1322_v30 = vpop.f32.mrb[5].mxu1 }
 0x545   :  { %v727_v31 = vadd.f32 %v1203_v28, %v719_v29 }
 0x547   :  { %1459 = vtanh.f32 %v727_v31  ;;  %v1204_v32 = vmul.f32 -1.442695, %v727_v31 }
 0x549   :  { %1461 = vpow2.f32 %v1204_v32 }
 0x551   :  { %v1460_v17 = vpop.eup %1459 }
 0x552   :  { %742 = vrot.lane.b32.xlu0 %v1460_v17, %s1724_s4 }
 0x553   :  { %v1462_v33 = vpop.eup %1461 }
 0x554   :  { %v731_v34 = vadd.f32 1.0, %v1462_v33 }
 0x556   :  { %1463 = vrcp.f32 %v731_v34 }
 0x560   :  { %v1464_v35 = vpop.eup %1463 }
 0x561   :  { %v740_v39 = vmul.f32 %v1464_v35, %v738_v38 }
 0x5c4   :  { %v743_v36 = vpop.permute.xlu0 %742 }
 0x5c5   :  { %v745_v37 = vmul.f32 %v1464_v35, %v743_v36 }
 0x5c7   :  { %747 = vrot.lane.b32.xlu0 %v745_v37, %s2234_s1 }
 0x639   :  { %v748_v41 = vpop.permute.xlu0 %747 }
 0x63a   :  { %v750_v42 = vadd.f32 %v748_v41, %v740_v39 }
 0x63c   :  { %1465 = vtanh.f32 %v750_v42 }
 0x646   :  { %v1466_v49 = vpop.eup %1465 }
 0x647   :  { %753 = vrot.lane.b32.xlu0 %v1466_v49, %s1724_s4 }
 0x6b9   :  { %v754_v51 = vpop.permute.xlu0 %753 }
 0x6ba   :  { %v756_v52 = vmul.f32 %v1464_v35, %v754_v51 }
 0x6bc   :  { %841 = vrot.lane.b32.xlu0 %v756_v52, %s2234_s1 }
 0x72e   :  { %v842_v53 = vpop.permute.xlu0 %841 }
 0x72f   :  { %960 = vst.msk [vmem:[#allocation14] sm:$0x3] %vm959_vm7, %v842_v53  ;;  %1343 = vmatmul.mubr.msk.f32.vlgmr.msra.gmra.mrb[6].mxu1 %vm240_vm1, %v842_v53 }
 0x730   :  { %1364 = vmatprep.mubr.msk.f32.mxu1 %vm1720_vm0, %v1721_v1  ;;  %1420 = vmatpush3.bf16.msra.mxu1 %v1419_v40 }
 0x731   :  { %1421 = vmatprep.subr.bf16.mxu1 %v1719_v0 }
 0x734   :  { %1423 = vmatpush3.bf16.msra.mxu1 %v1422_v11 }
 0x802   :  { %v911_v54 = vpop.f32.mrb[6].mxu1 }
 0x803   :  { %v912_v56 = vadd.f32 %v911_v54, %v836_v20  ;;  %v1344_v57 = vpop.f32.mrb[7].mxu1 }
 0x805   :  { %v923_v58 = vadd.f32 %v1212_v55, %v912_v56 }
 0x807   :  { %1467 = vtanh.f32 %v923_v58  ;;  %v1213_v60 = vmul.f32 -1.442695, %v923_v58 }
 0x809   :  { %1469 = vpow2.f32 %v1213_v60 }
 0x811   :  { %v1468_v59 = vpop.eup %1467 }
 0x812   :  { %939 = vrot.lane.b32.xlu0 %v1468_v59, %s1724_s4 }
 0x813   :  { %v1470_v61 = vpop.eup %1469 }
 0x814   :  { %v927_v62 = vadd.f32 1.0, %v1470_v61 }
 0x816   :  { %1471 = vrcp.f32 %v927_v62 }
 0x820   :  { %v1472_v63 = vpop.eup %1471 }
 0x821   :  { %v937_v4 = vmul.f32 %v1472_v63, %v935_v3 }
 0x884   :  { %v940_v2 = vpop.permute.xlu0 %939 }
 0x885   :  { %v942_v1 = vmul.f32 %v1472_v63, %v940_v2 }
 0x887   :  { %944 = vrot.lane.b32.xlu0 %v942_v1, %s2234_s1 }
 0x8f9   :  { %v945_v5 = vpop.permute.xlu0 %944 }
 0x8fa   :  { %v947_v6 = vadd.f32 %v945_v5, %v937_v4 }
 0x8fc   :  { %1473 = vtanh.f32 %v947_v6 }
 0x906   :  { %v1474_v12 = vpop.eup %1473 }
 0x907   :  { %950 = vrot.lane.b32.xlu1 %v1474_v12, %s1724_s4 }
 0x90b   :  { %964 = vrot.lane.b32.xlu1 %v750_v42, %s1725_s13 }
 0x979   :  { %v951_v13 = vpop.permute.xlu1 %950 }
 0x97a   :  { %v953_v14 = vmul.f32 %v1472_v63, %v951_v13 }
 0x97c   :  { %955 = vrot.lane.b32.xlu0 %v953_v14, %s2234_s1 }
 0x97d   :  { %v965_v15 = vpop.permute.xlu1 %964 }
 0x97e   :  { %970 = vst.msk [vmem:[#allocation16] sm:$0x3] %vm959_vm7, %v965_v15 }
 0x980   :  { %966 = vrot.lane.b32.xlu0 %v947_v6, %s1725_s13 }
 0x9ee   :  { %v956_v16 = vpop.permute.xlu0 %955 }
 0x9ef   :  { %961 = vst.msk [vmem:[#allocation14 + $0x2] sm:$0x3] %vm959_vm7, %v956_v16  ;;  %1365 = vmatmul.mubr.msk.f32.vlgmr.msra.gmra.mrb[8].mxu1 %vm240_vm1, %v956_v16 }
 0x9f2   :  { %v967_v0 = vpop.permute.xlu0 %966 }
 0x9f3   :  { %971 = vst.msk [vmem:[#allocation16 + $0x2] sm:$0x3] %vm959_vm7, %v967_v0 }
 0x9f4   :  { %1618 = shalt.err (!%p1615_p10)
}
 0x9f5   :  { %s1619_s23 = scalar_lea.hbm %s2212_s18, 64 }
 0x9f6   :  { %p1620_p11 = scmp.ne.s32.totalorder %s2212_s18, %s1619_s23  ;;  %p1623_p12 = scmp.lt.u32.totalorder %s1619_s23, %s2212_s18 }
 0x9f8   :  { %p1625_p13 = pnand %p1623_p12, %p1620_p11 }
 0x9fa   :  { %1628 = shalt.err (!%p1625_p13)
}
 0x9fb   :  { %1153 = dma.vmem_to_hbm [thread:$0]  %s1148_s10, 64, %s2212_s18, [#allocation15], %s2234_s1, %s2234_s1, %s2233_s24  }
 0x9fc   :  { %s1727_s12 = smov [#allocation16]   ;;  %s1728_s4 = smov [#allocation17]  }
 0x9fd   :  { %s1159_s28 = sshll.u32 %s1727_s12, 4  ;;  %s1172_s14 = sshll.u32 %s1728_s4, 4  ;;  %s1160_s28 = int_to_ptr.vmem [resolvable:$true] %s1159_s28  ;;  %s1173_s14 = int_to_ptr.vmem [resolvable:$true] %s1172_s14 }
 0x9fe   :  { %s1629_s2 = scalar_lea.vmem %s1160_s28, 64  ;;  %p1634_p1 = scmp.lt.s32.totalorder %s1160_s28, %s1160_s28 }
 0x9ff   :  { %p1630_p0 = scmp.ne.s32.totalorder %s1160_s28, %s1629_s2  ;;  %p1635_p2 = scmp.lt.s32.totalorder %s1629_s2, %s1629_s2 }
 0xa01   :  { %p1636_p3 = por %p1635_p2, %p1634_p1 }
 0xa03   :  { %p1637_p4 = pnand %p1636_p3, %p1630_p0 }
 0xa05   :  { %1640 = shalt.err (!%p1637_p4)
}
 0xa06   :  { %s1641_s3 = scalar_lea.hbm %s2213_s19, 64 }
 0xa07   :  { %p1642_p5 = scmp.ne.s32.totalorder %s2213_s19, %s1641_s3  ;;  %p1645_p6 = scmp.lt.u32.totalorder %s1641_s3, %s2213_s19 }
 0xa09   :  { %p1647_p7 = pnand %p1645_p6, %p1642_p5 }
 0xa0b   :  { %1650 = shalt.err (!%p1647_p7)
}
 0xa0c   :  { %1165 = dma.vmem_to_hbm [thread:$0]  %s1160_s28, 64, %s2213_s19, [#allocation15], %s2234_s1, %s2234_s1, %s2233_s24  }
 0xa0d   :  { %s1651_s13 = scalar_lea.vmem %s1173_s14, 32  ;;  %p1656_p9 = scmp.lt.s32.totalorder %s1173_s14, %s1173_s14 }
 0xa0e   :  { %p1652_p8 = scmp.ne.s32.totalorder %s1173_s14, %s1651_s13  ;;  %p1657_p10 = scmp.lt.s32.totalorder %s1651_s13, %s1651_s13 }
 0xa10   :  { %p1658_p11 = por %p1657_p10, %p1656_p9 }
 0xa12   :  { %p1659_p12 = pnand %p1658_p11, %p1652_p8 }
 0xa14   :  { %1662 = shalt.err (!%p1659_p12)
}
 0xa15   :  { %s1663_s6 = scalar_lea.hbm %s2214_s20, 32 }
 0xa16   :  { %p1664_p13 = scmp.ne.s32.totalorder %s2214_s20, %s1663_s6  ;;  %p1667_p0 = scmp.lt.u32.totalorder %s1663_s6, %s2214_s20 }
 0xa18   :  { %p1669_p1 = pnand %p1667_p0, %p1664_p13 }
 0xa1a   :  { %1672 = shalt.err (!%p1669_p1)
}
 0xa1b   :  { %1175 = dma.vmem_to_hbm [thread:$0]  %s1173_s14, 32, %s2214_s20, [#allocation18]   ;;  %vm1130_vm8 = vcmask 517120  }
 0xa1c   :  { %s2238_s5 = sld [smem:[#allocation31_spill]]  ;;  %s1729_s7 = smov [#allocation13]  }
 0xa1d   :  { %s1138_s17 = sshll.u32 %s1729_s7, 4  ;;  %s1139_s17 = int_to_ptr.vmem [resolvable:$true] %s1138_s17 }
 0xa1e   :  { %s1673_s26 = scalar_lea.vmem %s1139_s17, 32  ;;  %p1678_p3 = scmp.lt.s32.totalorder %s1139_s17, %s1139_s17 }
 0xa1f   :  { %p1674_p2 = scmp.ne.s32.totalorder %s1139_s17, %s1673_s26  ;;  %p1679_p4 = scmp.lt.s32.totalorder %s1673_s26, %s1673_s26 }
 0xa21   :  { %p1680_p5 = por %p1679_p4, %p1678_p3 }
 0xa22   :  { %v1216_v19 = vld [vmem:[%s2238_s5] ss:$0 sm:$0xff] }
 0xa23   :  { %p1681_p6 = pnand %p1680_p5, %p1674_p2 }
 0xac2   :  { %v1118_v18 = vpop.f32.mrb[8].mxu1 }
 0xac3   :  { %v1119_v20 = vadd.f32 %v1118_v18, %v2096_v23  ;;  %v1366_v21 = vpop.f32.mrb[9].mxu1 }
 0xac5   :  { %v1129_v22 = vadd.f32 %v1216_v19, %v1119_v20 }
 0xac7   :  { %1131 = vst.msk [vmem:[#allocation13] sm:$0x3] %vm1130_vm8, %v1129_v22 }
 0xac8   :  { %1684 = shalt.err (!%p1681_p6)
}
 0xac9   :  { %s2239_s28 = sld [smem:[#allocation32_spill]] }
 0xacf   :  { %s1685_s4 = scalar_lea.hbm %s2239_s28, 32 }
 0xad0   :  { %p1686_p7 = scmp.ne.s32.totalorder %s2239_s28, %s1685_s4  ;;  %p1689_p8 = scmp.lt.u32.totalorder %s1685_s4, %s2239_s28 }
 0xad2   :  { %p1691_p9 = pnand %p1689_p8, %p1686_p7 }
 0xad4   :  { %1694 = shalt.err (!%p1691_p9)
}
 0xad5   :  { %1141 = dma.vmem_to_hbm [thread:$0]  %s1139_s17, 32, %s2239_s28, [#allocation4]  }
 0xad6   :  { %1703 = dma.done.wait [#allocation4], 32  }
 0xad7   :  { %1704 = vsyncadd [#allocation4], 4294967264 }
 0xad8   :  { %1705 = dma.done.wait [#allocation15], 128  }
 0xad9   :  { %1706 = vsyncadd [#allocation15], 4294967168 }
 0xada   :  { %1707 = dma.done.wait [#allocation18], 32  }
 0xadb   :  { %1708 = vsyncadd [#allocation18], 4294967264 }
 0xadc   :  { %1188 = vsyncpa [#allocation3], 1 }
 0xadd   :  { %1189 = vsyncpa [#allocation6], 1 }
 0xade   :  { %1190 = vsyncpa [#allocation9], 1 }
 0xadf   :  { %1191 = vsyncpa [#allocation12], 1 }
 0xae0   :  { %1192 = vsyncpa [#allocation4], 1 }
 0xae1   :  { %1193 = vsyncpa [#allocation15], 1 }
 0xae2   :  { %1194 = vsyncpa [#allocation18], 1 }

</bundles_post_ra>
